<compile_context>
chip_gen: v6e
topology: v6e:2x2x1
jax: 0.10.0
libtpu: 0.0.40
codegen_flags: <defaults>
</compile_context>

<pallas_src>
import numpy as np
import jax
import jax.numpy as jnp
from jax.experimental import pallas as pl
from jax.experimental.pallas import tpu as pltpu

BN_EPS = 1e-5
MAX_TK = 4096                       # largest K tile (bf16: 256x4096 = 2 MiB / buffer)
VMEM_LIMIT = 48 * 1024 * 1024       # headroom under v7x 64 MiB physical VMEM


# --------------------------------------------------------------------------
# helpers
# --------------------------------------------------------------------------
def _round_up(v, m):
    return (v + m - 1) // m * m


def _pad2d(x, rows, cols, value=0.0):
    pr = rows - x.shape[0]
    pc = cols - x.shape[1]
    if pr == 0 and pc == 0:
        return x
    return jnp.pad(x, ((0, pr), (0, pc)), constant_values=value)


def _matmul_tiles(M, N, K):
    """Adaptive tile sizes: big K tiles, TM/TN capped at 256 (MXU-friendly,
    keeps parallel grid extent >= 2 on the layers that matter)."""
    TM = min(256, _round_up(max(M, 8), 8))
    TN = min(256, _round_up(max(N, 128), 128))
    Kp = _round_up(max(K, 128), 128)
    n_k = -(-Kp // MAX_TK)                       # number of K steps
    TK = _round_up(-(-Kp // n_k), 128)           # per-step K tile
    return TM, TN, TK, n_k


# --------------------------------------------------------------------------
# Pallas kernel: fused  (patches @ W') + shift  [+res]  [relu]
#   operands bf16, accumulation + epilogue f32, output dtype selectable
# --------------------------------------------------------------------------
def matmul_fused(a, b, shift, residual=None, relu=True, out_dtype=jnp.bfloat16):
    """a: (M,K), b: (K,N), shift: (N,), residual: (M,N) or None."""
    M, K = a.shape
    _, N = b.shape
    has_res = residual is not None

    TM, TN, TK, n_k = _matmul_tiles(M, N, K)
    Mp, Np, Kp = _round_up(M, TM), _round_up(N, TN), n_k * TK

    ap = _pad2d(a.astype(jnp.bfloat16), Mp, Kp)
    bp = _pad2d(b.astype(jnp.bfloat16), Kp, Np)
    hp = _pad2d(shift.reshape(1, N).astype(jnp.float32), 1, Np)
    inputs = [ap, bp, hp]
    if has_res:
        inputs.append(_pad2d(residual.astype(jnp.bfloat16), Mp, Np))

    if n_k == 1:
        # Single K step: no accumulator scratch, no reduction grid axis.
        def kernel(*refs):
            if has_res:
                a_ref, b_ref, h_ref, r_ref, o_ref = refs
            else:
                a_ref, b_ref, h_ref, o_ref = refs
            out = jnp.dot(a_ref[...], b_ref[...],
                          preferred_element_type=jnp.float32)
            out = out + h_ref[...]
            if has_res:
                out = out + r_ref[...].astype(jnp.float32)
            if relu:
                out = jnp.maximum(out, 0.0)
            o_ref[...] = out.astype(o_ref.dtype)

        grid = (Mp // TM, Np // TN)
        in_specs = [
            pl.BlockSpec((TM, TK), lambda i, j: (i, 0)),
            pl.BlockSpec((TK, TN), lambda i, j: (0, j)),
            pl.BlockSpec((1, TN), lambda i, j: (0, j)),
        ]
        if has_res:
            in_specs.append(pl.BlockSpec((TM, TN), lambda i, j: (i, j)))
        out_spec = pl.BlockSpec((TM, TN), lambda i, j: (i, j))
        scratch = []
        dims = ("parallel", "parallel")
    else:
        def kernel(*refs):
            if has_res:
                a_ref, b_ref, h_ref, r_ref, o_ref, acc_ref = refs
            else:
                a_ref, b_ref, h_ref, o_ref, acc_ref = refs
            k = pl.program_id(2)

            @pl.when(k == 0)
            def _():
                acc_ref[...] = jnp.zeros_like(acc_ref)

            acc_ref[...] += jnp.dot(a_ref[...], b_ref[...],
                                    preferred_element_type=jnp.float32)

            @pl.when(k == pl.num_programs(2) - 1)
            def _():
                out = acc_ref[...] + h_ref[...]
                if has_res:
                    out = out + r_ref[...].astype(jnp.float32)
                if relu:
                    out = jnp.maximum(out, 0.0)
                o_ref[...] = out.astype(o_ref.dtype)

        grid = (Mp // TM, Np // TN, n_k)
        in_specs = [
            pl.BlockSpec((TM, TK), lambda i, j, k: (i, k)),
            pl.BlockSpec((TK, TN), lambda i, j, k: (k, j)),
            pl.BlockSpec((1, TN), lambda i, j, k: (0, j)),
        ]
        if has_res:
            in_specs.append(pl.BlockSpec((TM, TN), lambda i, j, k: (i, j)))
        out_spec = pl.BlockSpec((TM, TN), lambda i, j, k: (i, j))
        scratch = [pltpu.VMEM((TM, TN), jnp.float32)]
        dims = ("parallel", "parallel", "arbitrary")

    out = pl.pallas_call(
        kernel,
        out_shape=jax.ShapeDtypeStruct((Mp, Np), out_dtype),
        grid_spec=pltpu.PrefetchScalarGridSpec(
            num_scalar_prefetch=0,
            grid=grid,
            in_specs=in_specs,
            out_specs=out_spec,
            scratch_shapes=scratch,
        ),
        compiler_params=pltpu.CompilerParams(
            dimension_semantics=dims,
            vmem_limit_bytes=VMEM_LIMIT),
    )(*inputs)
    return out[:M, :N]


def conv_bn_act(x, p, *, stride=1, padding=0, dilation=1, relu=True,
                residual=None, out_dtype=jnp.bfloat16):
    """x: (N,H,W,Cin) NHWC bf16; p['w']: (kh,kw,Cin,Cout) bf16 (BN scale folded);
    p['shift']: (Cout,) f32."""
    w, shift = p["w"], p["shift"]
    N, H, W, Cin = x.shape
    kh, kw, _, Cout = w.shape
    Ho = (H + 2 * padding - dilation * (kh - 1) - 1) // stride + 1
    Wo = (W + 2 * padding - dilation * (kw - 1) - 1) // stride + 1

    xp = jnp.pad(x, ((0, 0), (padding, padding), (padding, padding), (0, 0)))
    cols = []
    for i in range(kh):
        for j in range(kw):
            hi, wi = i * dilation, j * dilation
            patch = jax.lax.slice(
                xp, (0, hi, wi, 0),
                (N, hi + (Ho - 1) * stride + 1, wi + (Wo - 1) * stride + 1, Cin),
                (1, stride, stride, 1))
            cols.append(patch)
    if len(cols) == 1:
        a = cols[0].reshape(N * Ho * Wo, Cin)
    else:
        a = jnp.concatenate(cols, axis=-1).reshape(N * Ho * Wo, kh * kw * Cin)
    bmat = w.reshape(kh * kw * Cin, Cout)

    res = None
    if residual is not None:
        res = residual.reshape(N * Ho * Wo, Cout)

    out = matmul_fused(a, bmat, shift, residual=res, relu=relu,
                       out_dtype=out_dtype)
    return out.reshape(N, Ho, Wo, Cout)


# --------------------------------------------------------------------------
# MaxPool2d(kernel=3, stride=2, padding=1): tree of maximums over the 9
# strided slices (XLA-fused; avoids materializing a 9x stacked tensor).
# --------------------------------------------------------------------------
def maxpool2d_3x3_s2(x):
    N, H, W, C = x.shape
    Ho = (H + 2 - 3) // 2 + 1
    Wo = (W + 2 - 3) // 2 + 1
    xp = jnp.pad(x, ((0, 0), (1, 1), (1, 1), (0, 0)),
                 constant_values=float("-inf"))
    out = None
    for i in range(3):
        for j in range(3):
            patch = jax.lax.slice(
                xp, (0, i, j, 0),
                (N, i + (Ho - 1) * 2 + 1, j + (Wo - 1) * 2 + 1, C),
                (1, 2, 2, 1))
            out = patch if out is None else jnp.maximum(out, patch)
    return out


# --------------------------------------------------------------------------
# small separable linear ops (plain-JAX glue): adaptive avg pool & bilinear
# --------------------------------------------------------------------------
def _adaptive_pool_matrix(in_size, out_size):
    m = np.zeros((out_size, in_size), dtype=np.float32)
    for i in range(out_size):
        start = (i * in_size) // out_size
        end = -((-(i + 1) * in_size) // out_size)  # ceil
        m[i, start:end] = 1.0 / (end - start)
    return jnp.asarray(m)


def adaptive_avg_pool(x, out_hw):
    _, H, W, _ = x.shape
    Ph = _adaptive_pool_matrix(H, out_hw[0])
    Pw = _adaptive_pool_matrix(W, out_hw[1])
    return jnp.einsum("oh,nhwc,pw->nopc", Ph, x.astype(jnp.float32), Pw)


def _bilinear_matrix(in_size, out_size):
    m = np.zeros((out_size, in_size), dtype=np.float32)
    for i in range(out_size):
        src = 0.0 if out_size == 1 else i * (in_size - 1) / (out_size - 1)
        f = int(np.floor(src))
        c = min(f + 1, in_size - 1)
        frac = src - f
        m[i, f] += 1.0 - frac
        m[i, c] += frac
    return jnp.asarray(m)


def bilinear_resize(x, out_hw):  # align_corners=True
    _, H, W, _ = x.shape
    Rh = _bilinear_matrix(H, out_hw[0])
    Rw = _bilinear_matrix(W, out_hw[1])
    return jnp.einsum("oh,nhwc,pw->nopc", Rh, x.astype(jnp.float32), Rw)


# --------------------------------------------------------------------------
# parameter construction (deterministic, synthetic; BN scale folded into W)
# --------------------------------------------------------------------------
class ParamGen:
    def __init__(self, seed=0):
        self.key = jax.random.PRNGKey(seed)

    def next(self):
        self.key, sub = jax.random.split(self.key)
        return sub


def init_conv(key, kh, kw, cin, cout):
    std = np.sqrt(2.0 / (kh * kw * cin))
    return jax.random.normal(key, (kh, kw, cin, cout), jnp.float32) * std


def make_convbn(pg, kh, kw, cin, cout):
    w = init_conv(pg.next(), kh, kw, cin, cout)
    gamma = jnp.ones((cout,), jnp.float32)
    beta = jnp.zeros((cout,), jnp.float32)
    mean = jnp.zeros((cout,), jnp.float32)
    var = jnp.ones((cout,), jnp.float32)
    scale = gamma / jnp.sqrt(var + BN_EPS)
    shift = beta - mean * scale
    w_folded = (w * scale[None, None, None, :]).astype(jnp.bfloat16)
    return dict(w=w_folded, shift=shift)


def init_pspnet_params(n_channels, n_filters, num_classes, layers, seed=0):
    pg = ParamGen(seed)
    params = {}
    params["conv1"] = make_convbn(pg, 3, 3, n_channels, n_filters)
    params["conv2"] = make_convbn(pg, 3, 3, n_filters, n_filters)
    params["conv3"] = make_convbn(pg, 3, 3, n_filters, n_filters * 2)

    inplanes = 128
    planes_list = [64, 128, 256, 512]
    strides = [1, 2, 2, 1]
    dilations = [1, 1, 1, 2]
    for li, (planes, blocks, stride, dilation) in enumerate(
            zip(planes_list, layers, strides, dilations), start=1):
        blks = []
        for b in range(blocks):
            s = stride if b == 0 else 1
            blk = {
                "c1": make_convbn(pg, 1, 1, inplanes, planes),
                "c2": make_convbn(pg, 3, 3, planes, planes),
                "c3": make_convbn(pg, 1, 1, planes, planes * 4),
                "stride": s, "dilation": dilation,
            }
            if b == 0 and (stride != 1 or inplanes != planes * 4):
                blk["down"] = make_convbn(pg, 1, 1, inplanes, planes * 4)
            if b == 0:
                inplanes = planes * 4
            blks.append(blk)
        params[f"layer{li}"] = blks

    # PSP module
    feats, out_f, sizes = 2048, 512, (1, 2, 3, 6)
    params["psp_sizes"] = sizes
    params["psp_stages"] = [make_convbn(pg, 1, 1, feats, out_f) for _ in sizes]
    params["psp_bottleneck"] = make_convbn(pg, 3, 3, feats + len(sizes) * out_f, out_f)

    # head: 1x1 conv with bias, no BN / ReLU
    w = init_conv(pg.next(), 1, 1, out_f, num_classes)
    b = jax.random.normal(pg.next(), (num_classes,), jnp.float32) * 0.01
    params["head"] = dict(w=w.astype(jnp.bfloat16), shift=b)
    # TODO(synk): `dsn` auxiliary branch exists in __init__ but is unused in forward; omitted.
    return params


# --------------------------------------------------------------------------
# forward pass
# --------------------------------------------------------------------------
def bottleneck_fwd(x, p):
    s, d = p["stride"], p["dilation"]
    out = conv_bn_act(x, p["c1"], stride=1, padding=0, relu=True)
    out = conv_bn_act(out, p["c2"], stride=s, padding=d, dilation=d, relu=True)
    if "down" in p:
        residual = conv_bn_act(x, p["down"], stride=s, padding=0, relu=False)
    else:
        residual = x
    # conv3 + bn3 + residual add + relu, fused in one kernel
    return conv_bn_act(out, p["c3"], stride=1, padding=0, relu=True, residual=residual)


def psp_stage(x, size, p, out_hw):
    """Adaptive pool -> 1x1 conv + BN (no relu) -> bilinear upsample.
    M is tiny (<= batch*36); plain JAX avoids padded MXU work + launch overhead."""
    pooled = adaptive_avg_pool(x, (size, size))                     # f32
    w = p["w"].reshape(p["w"].shape[2], p["w"].shape[3]).astype(jnp.float32)
    out = jnp.einsum("nhwc,cd->nhwd", pooled, w) + p["shift"]
    out = bilinear_resize(out, out_hw)
    return out.astype(jnp.bfloat16)


def pspnet_forward(params, x_nchw):
    x = jnp.transpose(x_nchw.astype(jnp.float32), (0, 2, 3, 1))  # NCHW -> NHWC
    H_in, W_in = x.shape[1], x.shape[2]
    x = x.astype(jnp.bfloat16)

    x = conv_bn_act(x, params["conv1"], stride=2, padding=1, relu=True)
    x = conv_bn_act(x, params["conv2"], stride=1, padding=1, relu=True)
    x = conv_bn_act(x, params["conv3"], stride=1, padding=1, relu=True)
    x = maxpool2d_3x3_s2(x)

    for li in range(1, 5):
        for blk in params[f"layer{li}"]:
            x = bottleneck_fwd(x, blk)

    # PSP module
    h, w = x.shape[1], x.shape[2]
    priors = [psp_stage(x, size, sp, (h, w))
              for size, sp in zip(params["psp_sizes"], params["psp_stages"])]
    priors.append(x)
    cat = jnp.concatenate(priors, axis=-1)
    bottle = conv_bn_act(cat, params["psp_bottleneck"], stride=1, padding=1, relu=True)
    # Dropout2d(0.1) -> identity in eval mode

    out = conv_bn_act(bottle, params["head"], stride=1, padding=0, relu=False,
                      out_dtype=jnp.float32)
    out = bilinear_resize(out, (H_in, W_in))
    return jnp.transpose(out, (0, 3, 1, 2))  # NHWC -> NCHW


# --------------------------------------------------------------------------
if __name__ == "__main__":
    # Small instantiation of the module. Channel widths are fixed by the
    # architecture (inplanes=128 hard-coded, PSPModule(2048, 512)), so
    # n_filters must be 64; we shrink depth (layers) and spatial size instead.
    n_channels, n_filters, num_classes = 3, 64, 5
    layers = [1, 1, 2, 1]  # PyTorch default is [3, 4, 23, 3]
    batch, H, W = 2, 64, 64

    params = init_pspnet_params(n_channels, n_filters, num_classes, layers, seed=0)

    key = jax.random.PRNGKey(0)
    x = jax.random.normal(key, (batch, n_channels, H, W), jnp.float32)

    out = pspnet_forward(params, x)
    out = jax.block_until_ready(out)

    assert out.shape == (batch, num_classes, H, W), out.shape
    assert bool(jnp.all(jnp.isfinite(out)))
    print("KERNEL_OK")
</pallas_src>

<mosaic_0001>
module attributes {stable_mosaic.version = 11 : i64} {
  func.func @kernel(%arg0: i32, %arg1: i32, %arg2: memref<256x128xbf16, #tpu.memory_space<vmem>>, %arg3: memref<128x128xbf16, #tpu.memory_space<vmem>>, %arg4: memref<1x128xf32, #tpu.memory_space<vmem>>, %arg5: memref<256x128xbf16, #tpu.memory_space<vmem>>) attributes {dimension_semantics = [#tpu.dimension_semantics<parallel>, #tpu.dimension_semantics<parallel>], iteration_bounds = array<i64: 8, 1>, scalar_prefetch = 0 : i64, scratch_operands = 0 : i64, tpu.core_type = #tpu.core_type<tc>, window_params = [{transform_indices = @transform_0, window_bounds = array<i64: 256, 128>}, {transform_indices = @transform_1, window_bounds = array<i64: 128, 128>}, {transform_indices = @transform_2, window_bounds = array<i64: 1, 128>}, {transform_indices = @transform_3, window_bounds = array<i64: 256, 128>}]} {
    %c0 = arith.constant 0 : index
    %c0_0 = arith.constant 0 : index
    %0 = vector.load %arg2[%c0, %c0_0] : memref<256x128xbf16, #tpu.memory_space<vmem>>, vector<256x128xbf16>
    %c0_1 = arith.constant 0 : index
    %c0_2 = arith.constant 0 : index
    %1 = vector.load %arg3[%c0_1, %c0_2] : memref<128x128xbf16, #tpu.memory_space<vmem>>, vector<128x128xbf16>
    %cst = arith.constant dense<0.000000e+00> : vector<256x128xf32>
    %2 = tpu.matmul %0, %1, %cst {dimension_numbers = #tpu.dot_dimension_numbers<[1], [0], [0], [1], [0, 0, 1, 1], [], []>} : vector<256x128xbf16>, vector<128x128xbf16>, vector<256x128xf32> -> vector<256x128xf32>
    %c0_3 = arith.constant 0 : index
    %c0_4 = arith.constant 0 : index
    %3 = vector.load %arg4[%c0_3, %c0_4] : memref<1x128xf32, #tpu.memory_space<vmem>>, vector<1x128xf32>
    %4 = vector.broadcast %3 : vector<1x128xf32> to vector<256x128xf32>
    %5 = arith.addf %2, %4 : vector<256x128xf32>
    %cst_5 = arith.constant 0.000000e+00 : f32
    %6 = vector.broadcast %cst_5 : f32 to vector<256x128xf32>
    %7 = arith.maximumf %5, %6 : vector<256x128xf32>
    %8 = arith.truncf %7 : vector<256x128xf32> to vector<256x128xbf16>
    %c0_6 = arith.constant 0 : index
    %c0_7 = arith.constant 0 : index
    %9 = vector.load %arg5[%c0_6, %c0_7] : memref<256x128xbf16, #tpu.memory_space<vmem>>, vector<256x128xbf16>
    tpu.vector_store %arg5[%c0_6, %c0_7], %8 {strides = array<i32>} : memref<256x128xbf16, #tpu.memory_space<vmem>>, vector<256x128xbf16>,
    return
  }
  func.func @transform_0(%arg0: i32, %arg1: i32) -> (i32, i32) {
    %c0_i32 = arith.constant 0 : i32
    %c0_i32_0 = arith.constant 0 : i32
    return %arg0, %c0_i32 : i32, i32
  }
  func.func @transform_1(%arg0: i32, %arg1: i32) -> (i32, i32) {
    %c0_i32 = arith.constant 0 : i32
    %c0_i32_0 = arith.constant 0 : i32
    return %c0_i32, %arg1 : i32, i32
  }
  func.func @transform_2(%arg0: i32, %arg1: i32) -> (i32, i32) {
    %c0_i32 = arith.constant 0 : i32
    %c0_i32_0 = arith.constant 0 : i32
    return %c0_i32, %arg1 : i32, i32
  }
  func.func @transform_3(%arg0: i32, %arg1: i32) -> (i32, i32) {
    %c0_i32 = arith.constant 0 : i32
    return %arg0, %arg1 : i32, i32
  }
}

</mosaic_0001>

<bundles_post_ra>
// kernel: tpu_custom_call.1
= control target key start
LH: loop header
LB: loop body
LE: loop exit
PB: predicated region body
PF: predicated region fallthrough
CT: control target
= control target key end

     0   :  { %8 = vsyncpa [#allocation3], 0  ;;  %s1739_s0 = inlined_call_operand.hbm [shape: bf16[2048,128], index: 0, kind: input, shape index: {}]   ;;  %s1740_s1 = inlined_call_operand.hbm [shape: bf16[128,128], index: 1, kind: input, shape index: {}]   ;;  %s1741_s2 = inlined_call_operand.vmem [shape: f32[1,128], index: 2, kind: input, shape index: {}]   ;;  %s1742_s3 = inlined_call_operand.hbm [shape: bf16[2048,128], index: 3, kind: output, shape index: {}]  }
   0x1   :  { %10 = vsyncpa [#allocation3 + $0x1], 0 }
   0x2   :  { %11 = vsyncpa [#allocation6], 0 }
   0x3   :  { %12 = vsyncpa [#allocation4], 0 }
   0x4   :  { %14 = vsyncpa [#allocation4 + $0x1], 0  ;;  %s1476_s12 = smov 0   ;;  %s1478_s13 = smov 0  }
   0x5   :  { %s1480_s14 = smov 0   ;;  %s1482_s15 = smov 0  }
   0x6   :  { %s1484_s16 = smov 0   ;;  %s1486_s17 = smov 0  }
   0x7 LB: > { %s916_s18 = sadd.s32 4294967295, %s1447_s17   ;;  %s917_s19 = sadd.s32 4294967294, %s1447_s17   ;;  %s1447_s17 = sphi %s1486_s17, %s20_s17   ;;  %s1443_s16 = sphi %s1484_s16, %s1763_s16   ;;  %s1439_s15 = sphi %s1482_s15, %s1762_s15   ;;  %s1435_s14 = sphi %s1480_s14, %s1761_s14   ;;  %s1431_s13 = sphi %s1478_s13, %s1760_s13   ;;  %s1427_s12 = sphi %s1476_s12, %s1759_s12  }
   0x8   : > { %p52_p0 = scmp.ne.s32.totalorder %s1431_s13, %s1427_s12  ;;  %p1510_p1 = scmp.eq.s32.totalorder %s916_s18, 0 }
   0x9   : > { %p1514_p2 = scmp.eq.s32.totalorder %s916_s18, 7  ;;  %p136_p3 = scmp.eq.s32.totalorder %s917_s19, 7 }
   0xa   : > { %p1520_p4 = por %p1510_p1, %p52_p0  ;;  %p918_p5 = scmp.ge.s32.totalorder %s1447_s17, 1 }
   0xb   : > { %p1525_p6 = por %p136_p3, %p52_p0  ;;  %p143_p7 = scmp.lt.s32.totalorder %s1447_s17, 9 }
   0xc   : > { %s1449_s25 = smov [#allocation5]   ;;  %s32_s28 = sadd.s32 1, %s1443_s16 }
   0xd   : > { %s1749_s23 = scalar_select %p1525_p6, 1, 0 }
   0xe   : > { %p1530_p8 = pnand %p918_p5, %p143_p7  ;;  %s157_s26 = sshll.u32 %s1449_s25, 4  ;;  %s158_s26 = int_to_ptr.vmem [resolvable:$true] %s157_s26 }
   0xf   : > { %s1320_s29 = scalar_lea.vmem %s158_s26, 1024  ;;  %p1328_p3 = scmp.lt.s32.totalorder %s158_s26, %s158_s26 }
  0x10   : > { %p1216_p9 = pneg %p1530_p8  ;;  %p1321_p12 = scmp.ne.s32.totalorder %s158_s26, %s1320_s29 }
  0x11   : > { %p1329_p5 = scmp.lt.s32.totalorder %s1320_s29, %s1320_s29 }
  0x12   : > { %p1538_p10 = pnand %p1216_p9, %p1510_p1 }
  0x13   : > { %p1330_p7 = por %p1329_p5, %p1328_p3 }
  0x14   : > { %p1311_p11 = pneg %p1538_p10 }
  0x16   : > { %p1323_p13 = pnand %p1321_p12, %p1311_p11 }
  0x18   : > { %p1324_p0 = pneg %p1323_p13 }
  0x1a   : > { %p1331_p6 = pnand %p1330_p7, %p1324_p0 }
  0x1c   : > { %1334 = shalt.err (!%p1331_p6)
}
  0x1d   : > { %s1743_s30 = smov 64   ;;  %s1744_s4 = smov 4  }
  0x1e   : > { %1219 = dma.hbm_to_vmem [thread:$0]  (!%p1538_p10), %s1740_s1, 1024, %s158_s26, [#allocation6], %s1743_s30, %s1743_s30, %s1744_s4  }
  0x1f   : > { %p34_p6 = scmp.ge.s32.totalorder %s32_s28, 8  ;;  %s39_s7 = sadd.s32 1, %s1435_s14 }
  0x20   : > { %p46_p9 = scmp.ne.s32.totalorder %s1435_s14, %s1431_s13  ;;  %p47_p11 = scmp.eq.s32.totalorder %s1447_s17, 0 }
  0x21   : > { %s1765_s28 = smov (%p34_p6, %s32_s28), 0  ;;  %p1229_p0 = scmp.lt.s32.totalorder %s1447_s17, 8 }
  0x22   : > { %p1559_p12 = por %p47_p11, %p46_p9  ;;  %p1565_p13 = por %p1514_p2, %p46_p9 }
  0x23   : > { %s36_s10 = ssub.s32 %s1443_s16, %s1765_s28  ;;  %s177_s11 = sand.u32 1, %s1435_s14  }
  0x24   : > { %s1753_s9 = scalar_select %p1565_p13, 1, 0 }
  0x25   : > { %p37_p10 = scmp.eq.s32.totalorder %s36_s10, 0  ;;  %s922_s18 = sshll.u32 %s177_s11, 7 }
  0x26   : > { %s991_s25 = sshll.u32 %s1443_s16, 11  ;;  %s181_s5 = scalar_lea.vmem [#allocation2], %s922_s18 }
  0x27   : > { %s1574_s19 = scalar_select %p37_p10, %s1435_s14, %s39_s7  }
  0x28   : > { %s187_s29 = scalar_lea.hbm %s1739_s0, %s991_s25  ;;  %s188_s6 = sshll.u32 %s181_s5, 4  ;;  %s189_s6 = int_to_ptr.vmem [resolvable:$true] %s188_s6 }
  0x29   : > { %p1582_p2 = pnand %p1229_p0, %p1559_p12  ;;  %s178_s30 = scalar_lea.sflag [#allocation3], %s177_s11 }
  0x2a   : > { %s1348_s10 = scalar_lea.vmem %s189_s6, 2048  ;;  %s1452_s7 = smov [#allocation2]  }
  0x2b   : > { %p1337_p3 = pneg %p1582_p2  ;;  %p1349_p5 = scmp.ne.s32.totalorder %s189_s6, %s1348_s10 }
  0x2c   : > { %s1353_s4 = sshll.u32 %s1452_s7, 4  ;;  %s1354_s4 = int_to_ptr.vmem [resolvable:$false] %s1353_s4 }
  0x2d   : > { %p1351_p7 = pnand %p1349_p5, %p1337_p3  ;;  %s1355_s25 = scalar_lea.vmem %s1354_s4, 4096 }
  0x2e   : > { %p1356_p9 = scmp.lt.s32.totalorder %s189_s6, %s1354_s4  ;;  %p1357_p11 = scmp.lt.s32.totalorder %s1355_s25, %s1348_s10 }
  0x2f   : > { %p1352_p6 = pneg %p1351_p7 }
  0x30   : > { %p1358_p10 = por %p1357_p11, %p1356_p9 }
  0x32   : > { %p1359_p13 = pnand %p1358_p10, %p1352_p6 }
  0x34   : > { %1362 = shalt.err (!%p1359_p13)
}
  0x35   : > { %s1755_s8 = smov 4   ;;  %s1756_s18 = smov 64  }
  0x36   : > { %1223 = dma.hbm_to_vmem [thread:$0]  (!%p1582_p2), %s187_s29, 2048, %s189_s6, %s178_s30, %s1756_s18, %s1756_s18, %s1755_s8  }
  0x37   : > { %200 = sbr.rel (%p1530_p8) target bundleno = 339 (0x153), region = 32  ;;  %s1596_s11 = sand.u32 (!%p1530_p8), 1, %s1431_s13  }
  0x38   : > { %s926_s4 = sshll.u32 (!%p1530_p8), %s1596_s11, 7  ;;  %s203_s26 = scalar_lea.sflag (!%p1530_p8), [#allocation3], %s1596_s11 }
  0x39   : > { %s1602_s27 = scalar_lea.vmem (!%p1530_p8), [#allocation2], %s926_s4 }
  0x3c   : > { %1414 = dma.done.wait (%p1520_p4), %s203_s26, 2048  }
  0x3d   : > { %1416 = vsyncadd (%p1520_p4), %s203_s26, 4294965248 }
  0x3e   : > { %1418 = dma.done.wait (%p1510_p1), [#allocation6], 1024  }
  0x3f   : > { %1420 = vsyncadd (%p1510_p1), [#allocation6], 4294966272  ;;  %v1285_v0 = vld [vmem:[#allocation5 + $0x38] sm:$0xff]   ;;  %v1286_v1 = vld [vmem:[#allocation5 + $0x30] sm:$0xff]   ;;  %s1645_s24 = scalar_lea.vmem [#allocation7], %s926_s4  ;;  %s1024_s30 = sshll.u32 %s1439_s15, 11 }
  0x40   : > { %1144 = vmatprep.subr.bf16.mxu0 %v1285_v0  ;;  %1192 = vmatprep.subr.bf16.mxu1 %v1285_v0  ;;  %v1287_v2 = vld [vmem:[#allocation5 + $0x28] sm:$0xff]   ;;  %v1288_v3 = vld [vmem:[#allocation5 + $0x20] sm:$0xff]   ;;  %v1289_v6 = vld [vmem:[#allocation5 + $0x18] sm:$0xff]   ;;  %s809_s29 = sshll.u32 %s1645_s24, 4  ;;  %s1686_s21 = scalar_lea.hbm %s1742_s3, %s1024_s30  ;;  %s1688_s29 = int_to_ptr.vmem [resolvable:$true] %s809_s29 }
  0x41   : > { %1145 = vmatpush3.bf16.msra.mxu0 %v1285_v0  ;;  %1200 = vmatpush3.bf16.msra.mxu1 %v1285_v0  ;;  %v1293_v4 = vld [vmem:[%s1602_s27] sm:$0xff]   ;;  %v1290_v7 = vld [vmem:[#allocation5 + $0x10] sm:$0xff]   ;;  %v1291_v8 = vld [vmem:[#allocation5 + $0x8] sm:$0xff]   ;;  %s795_s15 = scalar_lea.sflag [#allocation4], %s1596_s11  ;;  %s1363_s10 = scalar_lea.vmem %s1688_s29, 2048 }
  0x42   : > { %1146 = vmatprep.subr.bf16.mxu0 %v1286_v1  ;;  %1193 = vmatprep.subr.bf16.mxu1 %v1286_v1  ;;  %v1294_v5 = vld [vmem:[%s1602_s27 + $0x40] sm:$0xff]   ;;  %v1295_v10 = vld [vmem:[%s1602_s27 + $0x8] sm:$0xff]   ;;  %v1297_v12 = vld [vmem:[%s1602_s27 + $0x10] sm:$0xff]   ;;  %p1364_p1 = scmp.ne.s32.totalorder %s1688_s29, %s1363_s10  ;;  %p1757_p4 = scmp.ne.s32.totalorder %s1753_s9, 0 }
  0x43   : > { %1160 = vmatprep.mubr.bf16.mxu0 %v1293_v4  ;;  %1176 = vmatprep.mubr.bf16.mxu1 %v1294_v5  ;;  %v1292_v9 = vld [vmem:[#allocation5] sm:$0xff]   ;;  %v1296_v11 = vld [vmem:[%s1602_s27 + $0x48] sm:$0xff]   ;;  %v1298_v13 = vld [vmem:[%s1602_s27 + $0x50] sm:$0xff]   ;;  %s1453_s7 = smov [#allocation7]  }
  0x44   : > { %v1299_v14 = vld [vmem:[%s1602_s27 + $0x18] sm:$0xff]   ;;  %v1301_v16 = vld [vmem:[%s1602_s27 + $0x20] sm:$0xff]   ;;  %v1303_v18 = vld [vmem:[%s1602_s27 + $0x28] sm:$0xff]   ;;  %p1365_p8 = pnand %p1364_p1, %p1757_p4  ;;  %s1367_s25 = sshll.u32 %s1453_s7, 4  ;;  %s1368_s25 = int_to_ptr.vmem [resolvable:$false] %s1367_s25 }
  0x45   : > { %1147 = vmatpush3.bf16.msra.mxu0 %v1286_v1  ;;  %1201 = vmatpush3.bf16.msra.mxu1 %v1286_v1  ;;  %v1300_v15 = vld [vmem:[%s1602_s27 + $0x58] sm:$0xff]   ;;  %v1302_v17 = vld [vmem:[%s1602_s27 + $0x60] sm:$0xff]   ;;  %v1304_v19 = vld [vmem:[%s1602_s27 + $0x68] sm:$0xff]   ;;  %s1369_s8 = scalar_lea.vmem %s1368_s25, 4096  ;;  %p1370_p13 = scmp.lt.s32.totalorder %s1688_s29, %s1368_s25 }
  0x46   : > { %1148 = vmatprep.subr.bf16.mxu0 %v1287_v2  ;;  %1194 = vmatprep.subr.bf16.mxu1 %v1287_v2  ;;  %v1305_v20 = vld [vmem:[%s1602_s27 + $0x30] sm:$0xff]   ;;  %v1307_v22 = vld [vmem:[%s1602_s27 + $0x38] sm:$0xff]   ;;  %v1631_v24 = vld [vmem:[%s1741_s2] ss:$0 sm:$0xff]  ;;  %p1366_p12 = pneg %p1365_p8  ;;  %p1371_p0 = scmp.lt.s32.totalorder %s1369_s8, %s1363_s10 }
  0x47   : > { %v1306_v21 = vld [vmem:[%s1602_s27 + $0x70] sm:$0xff]   ;;  %v1308_v23 = vld [vmem:[%s1602_s27 + $0x78] sm:$0xff]  }
  0x48   : > { %p1372_p2 = por %p1371_p0, %p1370_p13 }
  0x49   : > { %1149 = vmatpush3.bf16.msra.mxu0 %v1287_v2  ;;  %1202 = vmatpush3.bf16.msra.mxu1 %v1287_v2 }
  0x4a   : > { %1150 = vmatprep.subr.bf16.mxu0 %v1288_v3  ;;  %1195 = vmatprep.subr.bf16.mxu1 %v1288_v3  ;;  %p1373_p3 = pnand %p1372_p2, %p1366_p12 }
  0x4d   : > { %1151 = vmatpush3.bf16.msra.mxu0 %v1288_v3  ;;  %1203 = vmatpush3.bf16.msra.mxu1 %v1288_v3 }
  0x4e   : > { %1152 = vmatprep.subr.bf16.mxu0 %v1289_v6  ;;  %1196 = vmatprep.subr.bf16.mxu1 %v1289_v6 }
  0x51   : > { %1153 = vmatpush3.bf16.msra.mxu0 %v1289_v6  ;;  %1204 = vmatpush3.bf16.msra.mxu1 %v1289_v6 }
  0x52   : > { %1154 = vmatprep.subr.bf16.mxu0 %v1290_v7  ;;  %1197 = vmatprep.subr.bf16.mxu1 %v1290_v7 }
  0x55   : > { %1155 = vmatpush3.bf16.msra.mxu0 %v1290_v7  ;;  %1205 = vmatpush3.bf16.msra.mxu1 %v1290_v7 }
  0x56   : > { %1156 = vmatprep.subr.bf16.mxu0 %v1291_v8  ;;  %1198 = vmatprep.subr.bf16.mxu1 %v1291_v8 }
  0x59   : > { %1157 = vmatpush3.bf16.msra.mxu0 %v1291_v8  ;;  %1206 = vmatpush3.bf16.msra.mxu1 %v1291_v8 }
  0x5a   : > { %1158 = vmatprep.subr.bf16.mxu0 %v1292_v9  ;;  %1199 = vmatprep.subr.bf16.mxu1 %v1292_v9 }
  0x5d   : > { %1159 = vmatpush3.bf16.msra.mxu0 %v1292_v9  ;;  %1207 = vmatpush3.bf16.msra.mxu1 %v1292_v9 }
  0x60   : > { %1161 = vmatmul.mubr.bf16.vlgmr.msra.gmra.mxu0 %v1295_v10  ;;  %1177 = vmatmul.mubr.bf16.vlgmr.msra.gmra.mxu1 %v1296_v11 }
  0x61   : > { %1164 = vmatprep.mubr.bf16.mxu0 %v1297_v12  ;;  %1180 = vmatprep.mubr.bf16.mxu1 %v1298_v13 }
  0x68   : > { %1165 = vmatmul.mubr.bf16.gmra.mxu0 %v1299_v14  ;;  %1181 = vmatmul.mubr.bf16.gmra.mxu1 %v1300_v15 }
  0x69   : > { %1168 = vmatprep.mubr.bf16.mxu0 %v1301_v16  ;;  %1184 = vmatprep.mubr.bf16.mxu1 %v1302_v17 }
  0x70   : > { %1169 = vmatmul.mubr.bf16.gmra.mxu0 %v1303_v18  ;;  %1185 = vmatmul.mubr.bf16.gmra.mxu1 %v1304_v19 }
  0x71   : > { %1172 = vmatprep.mubr.bf16.mxu0 %v1305_v20  ;;  %1188 = vmatprep.mubr.bf16.mxu1 %v1306_v21 }
  0x78   : > { %1173 = vmatmul.mubr.bf16.gmra.mxu0 %v1307_v22  ;;  %1189 = vmatmul.mubr.bf16.gmra.mxu1 %v1308_v23 }
 0x120   : > { %v1162_v25 = vpop.f32.mrf.mxu0  ;;  %v1178_v26 = vpop.f32.mrf.mxu1 }
 0x121   : > { %v484_v27 = vadd.f32 %v1162_v25, %v1631_v24  ;;  %v548_v28 = vadd.f32 %v1178_v26, %v1631_v24 }
 0x122   : > { %v475_v29 = vpop.f32.mrf.mxu0  ;;  %v539_v30 = vpop.f32.mrf.mxu1 }
 0x123   : > { %v476_v31 = vadd.f32 %v1631_v24, %v475_v29  ;;  %v540_v32 = vadd.f32 %v1631_v24, %v539_v30  ;;  %v604_v37 = vmax.f32 %v484_v27, 0.0  ;;  %v620_v38 = vmax.f32 %v548_v28, 0.0 }
 0x124   : > { %v1163_v33 = vpop.f32.mrf.mxu0  ;;  %v1179_v34 = vpop.f32.mrf.mxu1 }
 0x125   : > { %v487_v35 = vadd.f32 %v1163_v33, %v1631_v24  ;;  %v551_v36 = vadd.f32 %v1179_v34, %v1631_v24  ;;  %v602_v45 = vmax.f32 %v476_v31, 0.0  ;;  %v618_v46 = vmax.f32 %v540_v32, 0.0 }
 0x126   : > { %v478_v39 = vpop.f32.mrf.mxu0  ;;  %v542_v40 = vpop.f32.mrf.mxu1 }
 0x127   : > { %v605_v41 = vmax.f32 %v487_v35, 0.0  ;;  %v621_v42 = vmax.f32 %v551_v36, 0.0  ;;  %v479_v43 = vadd.f32 %v1631_v24, %v478_v39  ;;  %v543_v44 = vadd.f32 %v1631_v24, %v542_v40 }
 0x128   : > { %v1166_v47 = vpop.f32.mrf.mxu0  ;;  %v1182_v48 = vpop.f32.mrf.mxu1 }
 0x129   : > { %v1033_v49 = vpack.c.bf16 %v605_v41, %v604_v37  ;;  %v1073_v50 = vpack.c.bf16 %v621_v42, %v620_v38  ;;  %v603_v51 = vmax.f32 %v479_v43, 0.0  ;;  %v619_v52 = vmax.f32 %v543_v44, 0.0 }
 0x12a   : > { %v500_v53 = vadd.f32 %v1166_v47, %v1631_v24  ;;  %v564_v54 = vadd.f32 %v1182_v48, %v1631_v24  ;;  %v491_v55 = vpop.f32.mrf.mxu0  ;;  %v555_v56 = vpop.f32.mrf.mxu1 }
 0x12b   : > { %1105 = vst [vmem:[%s1645_s24 + $0x8] sm:$0xff] %v1033_v49   ;;  %1113 = vst [vmem:[%s1645_s24 + $0x48] sm:$0xff] %v1073_v50   ;;  %v1028_v57 = vpack.c.bf16 %v603_v51, %v602_v45  ;;  %v1068_v58 = vpack.c.bf16 %v619_v52, %v618_v46  ;;  %v492_v59 = vadd.f32 %v1631_v24, %v491_v55 }
 0x12c   : > { %v556_v60 = vadd.f32 %v1631_v24, %v555_v56  ;;  %v1167_v61 = vpop.f32.mrf.mxu0  ;;  %v1183_v62 = vpop.f32.mrf.mxu1  ;;  %v608_v1 = vmax.f32 %v500_v53, 0.0  ;;  %v624_v2 = vmax.f32 %v564_v54, 0.0 }
 0x12d   : > { %1029 = vst [vmem:[%s1645_s24] sm:$0xff] %v1028_v57   ;;  %1112 = vst [vmem:[%s1645_s24 + $0x40] sm:$0xff] %v1068_v58   ;;  %v503_v63 = vadd.f32 %v1167_v61, %v1631_v24  ;;  %v567_v0 = vadd.f32 %v1183_v62, %v1631_v24  ;;  %v606_v9 = vmax.f32 %v492_v59, 0.0 }
 0x12e   : > { %v494_v3 = vpop.f32.mrf.mxu0  ;;  %v558_v4 = vpop.f32.mrf.mxu1  ;;  %v622_v10 = vmax.f32 %v556_v60, 0.0 }
 0x12f   : > { %v609_v5 = vmax.f32 %v503_v63, 0.0  ;;  %v625_v6 = vmax.f32 %v567_v0, 0.0  ;;  %v495_v7 = vadd.f32 %v1631_v24, %v494_v3  ;;  %v559_v8 = vadd.f32 %v1631_v24, %v558_v4 }
 0x130   : > { %v1170_v11 = vpop.f32.mrf.mxu0  ;;  %v1186_v12 = vpop.f32.mrf.mxu1 }
 0x131   : > { %v1043_v13 = vpack.c.bf16 %v609_v5, %v608_v1  ;;  %v1083_v14 = vpack.c.bf16 %v625_v6, %v624_v2  ;;  %v607_v15 = vmax.f32 %v495_v7, 0.0  ;;  %v623_v16 = vmax.f32 %v559_v8, 0.0 }
 0x132   : > { %v516_v17 = vadd.f32 %v1170_v11, %v1631_v24  ;;  %v580_v18 = vadd.f32 %v1186_v12, %v1631_v24  ;;  %v507_v19 = vpop.f32.mrf.mxu0  ;;  %v571_v20 = vpop.f32.mrf.mxu1 }
 0x133   : > { %1107 = vst [vmem:[%s1645_s24 + $0x18] sm:$0xff] %v1043_v13   ;;  %1115 = vst [vmem:[%s1645_s24 + $0x58] sm:$0xff] %v1083_v14   ;;  %v1038_v21 = vpack.c.bf16 %v607_v15, %v606_v9  ;;  %v1078_v22 = vpack.c.bf16 %v623_v16, %v622_v10  ;;  %v508_v23 = vadd.f32 %v1631_v24, %v507_v19 }
 0x134   : > { %v572_v25 = vadd.f32 %v1631_v24, %v571_v20  ;;  %v1171_v26 = vpop.f32.mrf.mxu0  ;;  %v1187_v27 = vpop.f32.mrf.mxu1  ;;  %v612_v30 = vmax.f32 %v516_v17, 0.0  ;;  %v628_v31 = vmax.f32 %v580_v18, 0.0 }
 0x135   : > { %1106 = vst [vmem:[%s1645_s24 + $0x10] sm:$0xff] %v1038_v21   ;;  %1114 = vst [vmem:[%s1645_s24 + $0x50] sm:$0xff] %v1078_v22   ;;  %v519_v28 = vadd.f32 %v1171_v26, %v1631_v24  ;;  %v583_v29 = vadd.f32 %v1187_v27, %v1631_v24  ;;  %v610_v38 = vmax.f32 %v508_v23, 0.0 }
 0x136   : > { %v510_v32 = vpop.f32.mrf.mxu0  ;;  %v574_v33 = vpop.f32.mrf.mxu1  ;;  %v626_v39 = vmax.f32 %v572_v25, 0.0 }
 0x137   : > { %v613_v34 = vmax.f32 %v519_v28, 0.0  ;;  %v629_v35 = vmax.f32 %v583_v29, 0.0  ;;  %v511_v36 = vadd.f32 %v1631_v24, %v510_v32  ;;  %v575_v37 = vadd.f32 %v1631_v24, %v574_v33 }
 0x138   : > { %v1174_v40 = vpop.f32.mrf.mxu0  ;;  %v1190_v41 = vpop.f32.mrf.mxu1 }
 0x139   : > { %v1053_v42 = vpack.c.bf16 %v613_v34, %v612_v30  ;;  %v1093_v43 = vpack.c.bf16 %v629_v35, %v628_v31  ;;  %v611_v44 = vmax.f32 %v511_v36, 0.0  ;;  %v627_v45 = vmax.f32 %v575_v37, 0.0 }
 0x13a   : > { %v532_v46 = vadd.f32 %v1174_v40, %v1631_v24  ;;  %v596_v47 = vadd.f32 %v1190_v41, %v1631_v24  ;;  %v523_v48 = vpop.f32.mrf.mxu0  ;;  %v587_v49 = vpop.f32.mrf.mxu1 }
 0x13b   : > { %1109 = vst [vmem:[%s1645_s24 + $0x28] sm:$0xff] %v1053_v42   ;;  %1117 = vst [vmem:[%s1645_s24 + $0x68] sm:$0xff] %v1093_v43   ;;  %v1048_v50 = vpack.c.bf16 %v611_v44, %v610_v38  ;;  %v1088_v51 = vpack.c.bf16 %v627_v45, %v626_v39  ;;  %v524_v52 = vadd.f32 %v1631_v24, %v523_v48 }
 0x13c   : > { %v588_v53 = vadd.f32 %v1631_v24, %v587_v49  ;;  %v1175_v54 = vpop.f32.mrf.mxu0  ;;  %v1191_v55 = vpop.f32.mrf.mxu1  ;;  %v616_v58 = vmax.f32 %v532_v46, 0.0  ;;  %v632_v59 = vmax.f32 %v596_v47, 0.0 }
 0x13d   : > { %1108 = vst [vmem:[%s1645_s24 + $0x20] sm:$0xff] %v1048_v50   ;;  %1116 = vst [vmem:[%s1645_s24 + $0x60] sm:$0xff] %v1088_v51   ;;  %v535_v56 = vadd.f32 %v1175_v54, %v1631_v24  ;;  %v599_v57 = vadd.f32 %v1191_v55, %v1631_v24  ;;  %v614_v2 = vmax.f32 %v524_v52, 0.0 }
 0x13e   : > { %v526_v60 = vpop.f32.mrf.mxu0  ;;  %v590_v61 = vpop.f32.mrf.mxu1  ;;  %v630_v3 = vmax.f32 %v588_v53, 0.0 }
 0x13f   : > { %v617_v62 = vmax.f32 %v535_v56, 0.0  ;;  %v633_v63 = vmax.f32 %v599_v57, 0.0  ;;  %v527_v0 = vadd.f32 %v1631_v24, %v526_v60  ;;  %v591_v1 = vadd.f32 %v1631_v24, %v590_v61 }
 0x141   : > { %v1063_v4 = vpack.c.bf16 %v617_v62, %v616_v58  ;;  %v1103_v5 = vpack.c.bf16 %v633_v63, %v632_v59  ;;  %v615_v6 = vmax.f32 %v527_v0, 0.0  ;;  %v631_v7 = vmax.f32 %v591_v1, 0.0 }
 0x143   : > { %1111 = vst [vmem:[%s1645_s24 + $0x38] sm:$0xff] %v1063_v4   ;;  %1119 = vst [vmem:[%s1645_s24 + $0x78] sm:$0xff] %v1103_v5   ;;  %v1058_v24 = vpack.c.bf16 %v615_v6, %v614_v2  ;;  %v1098_v8 = vpack.c.bf16 %v631_v7, %v630_v3 }
 0x145   : > { %1110 = vst [vmem:[%s1645_s24 + $0x30] sm:$0xff] %v1058_v24   ;;  %1118 = vst [vmem:[%s1645_s24 + $0x70] sm:$0xff] %v1098_v8  }
 0x146   : > { %1376 = shalt.err (!%p1373_p3)
}
 0x147   : > { %s1377_s18 = scalar_lea.hbm %s1686_s21, 2048  ;;  %s1381_s27 = scalar_lea.hbm %s1742_s3, 16384 }
 0x148   : > { %p1378_p5 = scmp.ne.s32.totalorder %s1686_s21, %s1377_s18  ;;  %p1382_p9 = scmp.lt.s32.totalorder %s1686_s21, %s1742_s3 }
 0x149   : > { %p1383_p11 = scmp.lt.s32.totalorder %s1381_s27, %s1377_s18 }
 0x14a   : > { %p1379_p7 = pnand %p1378_p5, %p1757_p4 }
 0x14b   : > { %p1384_p10 = por %p1383_p11, %p1382_p9 }
 0x14c   : > { %p1380_p6 = pneg %p1379_p7 }
 0x14e   : > { %p1385_p1 = pnand %p1384_p10, %p1380_p6 }
 0x150   : > { %1388 = shalt.err (!%p1385_p1)
}
 0x151   : > { %s1454_s24 = smov 64   ;;  %s1455_s30 = smov 4  }
 0x152   : > { %1214 = dma.vmem_to_hbm [thread:$0]  (%p1757_p4), %s1688_s29, 2048, %s1686_s21, %s795_s15, %s1454_s24, %s1454_s24, %s1455_s30  }
 0x153 PF: > { %p1231_p8 = scmp.ge.s32.totalorder %s1447_s17, 2  ;;  %s824_s5 = sand.u32 1, %s1427_s12  }
 0x154   : > { %p1758_p12 = scmp.ne.s32.totalorder %s1749_s23, 0  ;;  %s825_s6 = scalar_lea.sflag [#allocation4], %s824_s5 }
 0x156   : > { %p1225_p13 = pnand %p1231_p8, %p1758_p12 }
 0x158   : > { %p1226_p0 = pneg %p1225_p13 }
 0x15a   : > { %1422 = dma.done.wait (%p1226_p0), %s825_s6, 2048  }
 0x15b   : > { %1424 = vsyncadd (%p1226_p0), %s825_s6, 4294965248  ;;  %s20_s17 = sadd.s32 1, %s1447_s17   ;;  %s1759_s12 = smov %s1431_s13 }
 0x15c   : > { %p17_p2 = scmp.ge.s32.totalorder %s20_s17, 10   ;;  %s1760_s13 = smov %s1435_s14 }
 0x15d   : > { %s1761_s14 = smov %s1574_s19  ;;  %s1762_s15 = smov %s1443_s16 }
 0x15e   : > { %s1763_s16 = smov %s1765_s28  ;;  %19 = sbr.rel (!%p17_p2) target bundleno = 7 (0x7), region = 85 }
 0x163   :  { %830 = vsyncpa [#allocation3], 1 }
 0x164   :  { %832 = vsyncpa [#allocation3 + $0x1], 1 }
 0x165   :  { %833 = vsyncpa [#allocation6], 1 }
 0x166   :  { %834 = vsyncpa [#allocation4], 1 }
 0x167   :  { %836 = vsyncpa [#allocation4 + $0x1], 1 }

</bundles_post_ra>
